<compile_context>
chip_gen: v7x
topology: tpu7x:2x2x1
jax: 0.10.0
libtpu: 0.0.40
codegen_flags: <defaults>
</compile_context>

<pallas_src>
import functools
import math

import jax
import jax.numpy as jnp
from jax.experimental import pallas as pl
from jax.experimental.pallas import tpu as pltpu


def _round_up(v: int, m: int) -> int:
    return ((v + m - 1) // m) * m


def _posemb_kernel(x_ref, pe_ref, o_ref, *, batch_chunk: int, d: int):
    # x_ref : [TILE_S, batch_chunk * d]  lane-dense block of the flattened input
    # pe_ref: [TILE_S, d]                matching rows of the sinusoidal table
    #
    # Single streaming pass: for each batch element in this lane chunk, add pe
    # to its 128-aligned lane slice.  No [TILE_S, B*d] broadcast/concat temp is
    # ever materialized in VMEM, and every store is an unmasked full-lane vst
    # (d is a multiple of 128 and all slice starts/widths are static).
    pe = pe_ref[...]
    for b in range(batch_chunk):          # static unroll
        lo = b * d
        o_ref[:, lo:lo + d] = x_ref[:, lo:lo + d] + pe


def make_pe_table(d_model: int, max_len: int = 5000, dtype=jnp.float32):
    """Deterministic sinusoidal table, identical to the PyTorch __init__.

    Like the PyTorch original, assumes d_model is even.  Store it in the
    activation dtype at parameter-setup time to avoid per-call casts.
    """
    position = jnp.arange(0, max_len, dtype=jnp.float32)[:, None]        # [L, 1]
    div_term = jnp.exp(
        jnp.arange(0, d_model, 2, dtype=jnp.float32)
        * (-math.log(10000.0) / d_model)
    )                                                                     # [D/2]
    pe = jnp.zeros((max_len, d_model), dtype=jnp.float32)
    pe = pe.at[:, 0::2].set(jnp.sin(position * div_term))
    pe = pe.at[:, 1::2].set(jnp.cos(position * div_term))
    return pe.astype(dtype)                                               # [L, D]


def positional_embedding(
    x: jax.Array,
    pe_table: jax.Array,
    *,
    target_tile_bytes: int = 4 * 1024 * 1024,
) -> jax.Array:
    """x: [S, B, D] -> [S, B, D]  (x + pe[:S], dropout = identity / eval)."""
    S, B, D = x.shape
    max_len, d_tab = pe_table.shape
    if d_tab != D:
        raise ValueError(f"pe_table embed dim {d_tab} != input embed dim {D}")
    if S > max_len:
        raise ValueError(f"sequence length {S} exceeds pe_table max_len {max_len}")

    itemsize = jnp.dtype(x.dtype).itemsize

    # Lane-dense embedding dim: pad D up to a multiple of 128 so chunked stores
    # are unmasked full-lane vst's.  No-op when D is already 128-aligned.
    d_pad = D if D % 128 == 0 else _round_up(D, 128)

    pe = pe_table
    if pe.dtype != x.dtype:
        # Ideally the table is stored in the activation dtype at setup time;
        # this is a cheap fallback.
        pe = pe.astype(x.dtype)

    if d_pad != D:
        x_in = jnp.pad(x, ((0, 0), (0, 0), (0, d_pad - D))).reshape(S, B * d_pad)
        pe = jnp.pad(pe[:S], ((0, 0), (0, d_pad - D)))
    else:
        # Free, contiguous reshape.  Pass the FULL table: the BlockSpec only
        # DMAs the first ceil(S / tile_s) row tiles, so no wrapper slice/copy.
        x_in = x.reshape(S, B * d_pad)

    row_bytes = B * d_pad * itemsize

    # --- tile selection ------------------------------------------------------
    if row_bytes <= target_tile_bytes:
        bc = B                                    # one lane chunk = whole batch
        tile_s = max(1, target_tile_bytes // row_bytes)
        if tile_s >= S:
            tile_s = S                            # full extent: always legal
        else:
            tile_s = max(8, (tile_s // 8) * 8)    # (8, 128) sublane alignment
        # v7x megacore: with a single lane chunk, keep >= 2 grid steps so both
        # TensorCores share the HBM stream (no effect on v5e/v6e: 1 TC).
        if S > 8:
            half_s = _round_up(pl.cdiv(S, 2), 8)
            tile_s = min(tile_s, half_s)
    else:
        # Very wide rows: add a lane (batch-chunk) grid axis in whole-D_pad
        # multiples so stores stay lane-dense and VMEM is never blown.
        tile_s = 8 if S >= 8 else S
        bc = max(1, target_tile_bytes // (tile_s * d_pad * itemsize))
        bc = min(bc, B)

    # pe block's sublane dim must be a multiple of 8 OR equal pe's full row
    # count; slice the table to S rows for the small-S full-extent case.
    if tile_s % 8 != 0 and pe.shape[0] != S:
        pe = pe[:S]

    grid = (pl.cdiv(S, tile_s), pl.cdiv(B, bc))

    # Explicit VMEM budget: double-buffered x, out and pe tiles (+ headroom).
    # Kept <= 32 MiB so the same wrapper is safe on v7x (64 MiB physical VMEM)
    # while still raising v5e's 16 MiB default scoped limit when needed.
    x_tile_bytes = tile_s * bc * d_pad * itemsize
    pe_tile_bytes = tile_s * d_pad * itemsize
    vmem_need = 4 * x_tile_bytes + 2 * pe_tile_bytes
    vmem_limit = int(min(max(vmem_need + (4 << 20), 16 << 20), 32 << 20))

    # Advisory cost hint: memory-bound elementwise add.
    cost = pl.CostEstimate(
        flops=S * B * D,
        transcendentals=0,
        bytes_accessed=2 * S * B * D * itemsize + S * D * itemsize,
    )

    out2 = pl.pallas_call(
        functools.partial(_posemb_kernel, batch_chunk=bc, d=d_pad),
        out_shape=jax.ShapeDtypeStruct((S, B * d_pad), x.dtype),
        grid_spec=pltpu.PrefetchScalarGridSpec(
            num_scalar_prefetch=0,
            grid=grid,
            in_specs=[
                pl.BlockSpec((tile_s, bc * d_pad), lambda i, j: (i, j)),
                pl.BlockSpec((tile_s, d_pad), lambda i, j: (i, 0)),
            ],
            out_specs=pl.BlockSpec((tile_s, bc * d_pad), lambda i, j: (i, j)),
        ),
        compiler_params=pltpu.CompilerParams(
            # Every (S-tile, batch-chunk) block is independent.
            dimension_semantics=("parallel", "parallel"),
            vmem_limit_bytes=vmem_limit,
        ),
        cost_estimate=cost,
    )(x_in, pe)

    out = out2.reshape(S, B, d_pad)
    if d_pad != D:
        out = out[:, :, :D]
    return out


if __name__ == "__main__":
    # Case 1: small shapes consistent with the module's forward: [seq, batch, d_model]
    S, B, D = 8, 2, 32
    MAX_LEN = 64  # small max_len for the synthetic table

    key = jax.random.PRNGKey(0)
    x = jax.random.normal(key, (S, B, D), dtype=jnp.float32)
    pe_table = make_pe_table(D, max_len=MAX_LEN, dtype=jnp.float32)

    out = jax.block_until_ready(positional_embedding(x, pe_table))
    ref = x + pe_table[:S, :][:, None, :]
    assert out.shape == (S, B, D)
    assert jnp.allclose(out, ref, atol=1e-6), "mismatch vs reference"

    # Case 2: multi-step S grid with a ragged last tile + lane-padding path.
    S2, B2, D2 = 20, 3, 32
    x2 = jax.random.normal(jax.random.PRNGKey(1), (S2, B2, D2), dtype=jnp.float32)
    pe_table2 = make_pe_table(D2, max_len=MAX_LEN, dtype=jnp.float32)
    out2 = jax.block_until_ready(
        positional_embedding(x2, pe_table2, target_tile_bytes=B2 * 128 * 4 * 8)
    )
    ref2 = x2 + pe_table2[:S2, :][:, None, :]
    assert out2.shape == (S2, B2, D2)
    assert jnp.allclose(out2, ref2, atol=1e-6), "mismatch vs reference (tiled S)"

    # Case 3: 128-aligned D (no padding, full table passed) exercising the
    # lane (batch-chunk) grid axis via a tiny tile budget.
    S3, B3, D3 = 24, 3, 128
    x3 = jax.random.normal(jax.random.PRNGKey(2), (S3, B3, D3), dtype=jnp.float32)
    pe_table3 = make_pe_table(D3, max_len=MAX_LEN, dtype=jnp.float32)
    out3 = jax.block_until_ready(
        positional_embedding(x3, pe_table3, target_tile_bytes=1024)
    )
    ref3 = x3 + pe_table3[:S3, :][:, None, :]
    assert out3.shape == (S3, B3, D3)
    assert jnp.allclose(out3, ref3, atol=1e-6), "mismatch vs reference (lane chunks)"

    print("KERNEL_OK")
</pallas_src>

<mosaic_0001>
module attributes {stable_mosaic.version = 11 : i64} {
  func.func @_posemb_kernel(%arg0: i32, %arg1: i32, %arg2: memref<8x256xf32, #tpu.memory_space<vmem>>, %arg3: memref<8x128xf32, #tpu.memory_space<vmem>>, %arg4: memref<8x256xf32, #tpu.memory_space<vmem>>) attributes {dimension_semantics = [#tpu.dimension_semantics<parallel>, #tpu.dimension_semantics<parallel>], iteration_bounds = array<i64: 1, 1>, scalar_prefetch = 0 : i64, scratch_operands = 0 : i64, tpu.core_type = #tpu.core_type<tc>, window_params = [{transform_indices = @transform_0, window_bounds = array<i64: 8, 256>}, {transform_indices = @transform_1, window_bounds = array<i64: 8, 128>}, {transform_indices = @transform_2, window_bounds = array<i64: 8, 256>}]} {
    %c0 = arith.constant 0 : index
    %c0_0 = arith.constant 0 : index
    %0 = vector.load %arg3[%c0, %c0_0] : memref<8x128xf32, #tpu.memory_space<vmem>>, vector<8x128xf32>
    %c0_1 = arith.constant 0 : index
    %c0_2 = arith.constant 0 : index
    %1 = vector.load %arg2[%c0_1, %c0_2] : memref<8x256xf32, #tpu.memory_space<vmem>>, vector<8x128xf32>
    %2 = arith.addf %1, %0 : vector<8x128xf32>
    %c0_3 = arith.constant 0 : index
    %c0_4 = arith.constant 0 : index
    %3 = vector.load %arg4[%c0_3, %c0_4] : memref<8x256xf32, #tpu.memory_space<vmem>>, vector<8x128xf32>
    tpu.vector_store %arg4[%c0_3, %c0_4], %2 {strides = array<i32>} : memref<8x256xf32, #tpu.memory_space<vmem>>, vector<8x128xf32>,
    %c0_5 = arith.constant 0 : index
    %c128 = arith.constant 128 : index
    %4 = vector.load %arg2[%c0_5, %c128] : memref<8x256xf32, #tpu.memory_space<vmem>>, vector<8x128xf32>
    %5 = arith.addf %4, %0 : vector<8x128xf32>
    %c0_6 = arith.constant 0 : index
    %c128_7 = arith.constant 128 : index
    %6 = vector.load %arg4[%c0_6, %c128_7] : memref<8x256xf32, #tpu.memory_space<vmem>>, vector<8x128xf32>
    tpu.vector_store %arg4[%c0_6, %c128_7], %5 {strides = array<i32>} : memref<8x256xf32, #tpu.memory_space<vmem>>, vector<8x128xf32>,
    return
  }
  func.func @transform_0(%arg0: i32, %arg1: i32) -> (i32, i32) {
    %c0_i32 = arith.constant 0 : i32
    return %arg0, %arg1 : i32, i32
  }
  func.func @transform_1(%arg0: i32, %arg1: i32) -> (i32, i32) {
    %c0_i32 = arith.constant 0 : i32
    %c0_i32_0 = arith.constant 0 : i32
    return %arg0, %c0_i32 : i32, i32
  }
  func.func @transform_2(%arg0: i32, %arg1: i32) -> (i32, i32) {
    %c0_i32 = arith.constant 0 : i32
    return %arg0, %arg1 : i32, i32
  }
}

</mosaic_0001>

<bundles_post_ra>
// kernel: tpu_custom_call.1
= control target key start
LH: loop header
LB: loop body
LE: loop exit
PB: predicated region body
PF: predicated region fallthrough
CT: control target
= control target key end

     0   :  { %7 = vsyncpa [#allocation3], 0  ;;  %s188_s0 = inlined_call_operand.hbm [shape: f32[8,256], index: 0, kind: input, shape index: {}]   ;;  %s189_s1 = inlined_call_operand.hbm [shape: f32[8,128], index: 1, kind: input, shape index: {}]   ;;  %s190_s2 = inlined_call_operand.hbm [shape: f32[8,256], index: 2, kind: output, shape index: {}]  }
   0x1   :  { %8 = vsyncpa [#allocation6], 0 }
   0x2   :  { %9 = vsyncpa [#allocation4], 0  ;;  %s134_s9 = smov [#allocation2]   ;;  %s135_s11 = smov [#allocation5]  }
   0x3   :  { %s16_s10 = sshll.u32 %s134_s9, 4  ;;  %s26_s12 = sshll.u32 %s135_s11, 4  ;;  %s17_s10 = int_to_ptr.vmem [resolvable:$true] %s16_s10  ;;  %s27_s12 = int_to_ptr.vmem [resolvable:$true] %s26_s12 }
   0x4   :  { %s62_s15 = scalar_lea.hbm %s188_s0, 256 }
   0x5   :  { %p63_p0 = scmp.ne.s32.totalorder %s188_s0, %s62_s15  ;;  %p66_p1 = scmp.lt.u32.totalorder %s62_s15, %s188_s0 }
   0x7   :  { %p68_p2 = pnand %p66_p1, %p63_p0 }
   0x9   :  { %71 = shalt.err (!%p68_p2)
}
   0xa   :  { %s72_s20 = scalar_lea.vmem %s17_s10, 256  ;;  %p77_p4 = scmp.lt.s32.totalorder %s17_s10, %s17_s10 }
   0xb   :  { %p73_p3 = scmp.ne.s32.totalorder %s17_s10, %s72_s20  ;;  %p78_p5 = scmp.lt.s32.totalorder %s72_s20, %s72_s20 }
   0xd   :  { %p79_p6 = por %p78_p5, %p77_p4 }
   0xf   :  { %p80_p7 = pnand %p79_p6, %p73_p3 }
  0x11   :  { %83 = shalt.err (!%p80_p7)
}
  0x12   :  { %19 = dma.hbm_to_vmem [thread:$0]  %s188_s0, 256, %s17_s10, [#allocation3]  }
  0x13   :  { %s84_s25 = scalar_lea.hbm %s189_s1, 128 }
  0x14   :  { %p85_p8 = scmp.ne.s32.totalorder %s189_s1, %s84_s25  ;;  %p88_p9 = scmp.lt.u32.totalorder %s84_s25, %s189_s1 }
  0x16   :  { %p90_p10 = pnand %p88_p9, %p85_p8 }
  0x18   :  { %93 = shalt.err (!%p90_p10)
}
  0x19   :  { %s94_s30 = scalar_lea.vmem %s27_s12, 128  ;;  %p99_p12 = scmp.lt.s32.totalorder %s27_s12, %s27_s12 }
  0x1a   :  { %p95_p11 = scmp.ne.s32.totalorder %s27_s12, %s94_s30  ;;  %p100_p13 = scmp.lt.s32.totalorder %s94_s30, %s94_s30 }
  0x1c   :  { %p101_p0 = por %p100_p13, %p99_p12 }
  0x1e   :  { %p102_p1 = pnand %p101_p0, %p95_p11 }
  0x20   :  { %105 = shalt.err (!%p102_p1)
}
  0x21   :  { %29 = dma.hbm_to_vmem [thread:$0]  %s189_s1, 128, %s27_s12, [#allocation6]  }
  0x22   :  { %128 = dma.done.wait [#allocation3], 256  }
  0x23   :  { %129 = vsyncadd [#allocation3], 4294967040 }
  0x24   :  { %130 = dma.done.wait [#allocation6], 128  }
  0x25   :  { %131 = vsyncadd [#allocation6], 4294967168  ;;  %s136_s4 = smov [#allocation7]   ;;  %v36_v0 = vld [vmem:[#allocation5] sm:$0xff]  ;;  %v37_v1 = vld [vmem:[#allocation2] sm:$0xff] }
  0x26   :  { %s49_s5 = sshll.u32 %s136_s4, 4  ;;  %v40_v2 = vld [vmem:[#allocation2 + $0x8] sm:$0xff]  ;;  %v38_v3 = vadd.f32 %v37_v1, %v36_v0  ;;  %s50_s5 = int_to_ptr.vmem [resolvable:$true] %s49_s5 }
  0x27   :  { %v41_v4 = vadd.f32 %v40_v2, %v36_v0  ;;  %s106_s6 = scalar_lea.vmem %s50_s5, 256  ;;  %p111_p3 = scmp.lt.s32.totalorder %s50_s5, %s50_s5 }
  0x28   :  { %39 = vst [vmem:[#allocation7] sm:$0xff] %v38_v3  ;;  %p107_p2 = scmp.ne.s32.totalorder %s50_s5, %s106_s6  ;;  %p112_p4 = scmp.lt.s32.totalorder %s106_s6, %s106_s6 }
  0x29   :  { %42 = vst [vmem:[#allocation7 + $0x8] sm:$0xff] %v41_v4 }
  0x2a   :  { %p113_p5 = por %p112_p4, %p111_p3 }
  0x2c   :  { %p114_p6 = pnand %p113_p5, %p107_p2 }
  0x2e   :  { %117 = shalt.err (!%p114_p6)
}
  0x2f   :  { %s118_s8 = scalar_lea.hbm %s190_s2, 256 }
  0x30   :  { %p119_p7 = scmp.ne.s32.totalorder %s190_s2, %s118_s8  ;;  %p122_p8 = scmp.lt.u32.totalorder %s118_s8, %s190_s2 }
  0x32   :  { %p124_p9 = pnand %p122_p8, %p119_p7 }
  0x34   :  { %127 = shalt.err (!%p124_p9)
}
  0x35   :  { %52 = dma.vmem_to_hbm [thread:$0]  %s50_s5, 256, %s190_s2, [#allocation4]  }
  0x36   :  { %132 = dma.done.wait [#allocation4], 256  }
  0x37   :  { %133 = vsyncadd [#allocation4], 4294967040 }
  0x38   :  { %56 = vsyncpa [#allocation3], 1 }
  0x39   :  { %57 = vsyncpa [#allocation6], 1 }
  0x3a   :  { %58 = vsyncpa [#allocation4], 1 }

</bundles_post_ra>
